<compile_context>
chip_gen: v6e
topology: v6e:2x2x1
jax: 0.10.0
libtpu: 0.0.40
codegen_flags: <defaults>
</compile_context>

<pallas_src>
import numpy as np

import jax
import jax.numpy as jnp
from jax.experimental import pallas as pl
from jax.experimental.pallas import tpu as pltpu

NUM_OUTER_ITERS = 3


def _build_transform_matrix(b: int, num_outer: int) -> np.ndarray:
    """Fold the (bounded) while/for control flow into one b x b matrix.

    Each step `X = X + X[:, idx]` acts on the rows (axis 1) as
    new_row_j = old_row_j + old_row_idx, i.e. left-multiplication by
    T = I with column `idx` incremented by 1.  Built in plain NumPy at
    trace time; entries are small exact integers.
    """
    M = np.eye(b, dtype=np.float64)
    c = 1
    for _ in range(num_outer):
        for idx in range(b):
            if c % (idx + 1):
                T = np.eye(b, dtype=np.float64)
                T[:, idx] += 1.0
                M = T @ M
        c *= 3
    return M.astype(np.float32)


def _make_collapsed_kernel(M: np.ndarray, a: int, b: int, d: int):
    """Kernel with M baked in as compile-time constants.

    out[:, j, :] = sum_k M[j, k] * X[:, k, :], fully unrolled over (j, k):
    pure VALU multiply-adds on static slices, no extra operand, no XLU reduce,
    no MXU.  Zero weights are skipped and unit weights avoid the multiply.
    """
    weights = [[float(M[j, k]) for k in range(b)] for j in range(b)]

    def kernel(x_ref, o_ref):
        X = x_ref[...].astype(jnp.float32)                 # (a, b, d), read fully first
        rows = [X[:, k:k + 1, :] for k in range(b)]        # b static (a, 1, d) slices
        for j in range(b):
            acc = None
            for k in range(b):
                w = weights[j][k]
                if w == 0.0:
                    continue
                term = rows[k] if w == 1.0 else rows[k] * jnp.float32(w)
                acc = term if acc is None else acc + term
            if acc is None:
                acc = jnp.zeros((a, 1, d), jnp.float32)
            o_ref[:, j:j + 1, :] = acc.astype(o_ref.dtype)

    return kernel


def model_forward(x1, num_outer: int = NUM_OUTER_ITERS):
    a, b, d = x1.shape
    M = _build_transform_matrix(b, num_outer)              # trace-time NumPy constant

    kernel = _make_collapsed_kernel(M, a, b, d)
    return pl.pallas_call(
        kernel,
        out_shape=jax.ShapeDtypeStruct((a, b, d), x1.dtype),
        in_specs=[pl.BlockSpec(memory_space=pltpu.MemorySpace.VMEM)],   # whole array
        out_specs=pl.BlockSpec(memory_space=pltpu.MemorySpace.VMEM),
        input_output_aliases={0: 0},     # result reuses x1's HBM buffer
    )(x1)


def _fused_xla_forward(x1, num_outer: int = NUM_OUTER_ITERS):
    """Recommended production path: one fused XLA contraction, no custom call."""
    M = jnp.asarray(_build_transform_matrix(x1.shape[1], num_outer))
    return jnp.einsum("jk,akd->ajd", M, x1.astype(jnp.float32)).astype(x1.dtype)


def _reference_forward(x1, num_outer: int = NUM_OUTER_ITERS):
    """Pure-JAX reference mirroring the (bounded) PyTorch control flow step by step."""
    X = x1.astype(jnp.float32)
    b = X.shape[1]
    c = 1
    for _ in range(num_outer):
        for idx in range(b):
            if c % (idx + 1):
                X = X + X[:, idx:idx + 1, :]
        c *= 3
    return X.astype(x1.dtype)


if __name__ == "__main__":
    key = jax.random.PRNGKey(0)
    x1 = jax.random.normal(key, (3, 5, 2), dtype=jnp.float32)

    # Compute the step-by-step reference before the kernel call (the kernel's
    # output aliases x1's buffer).
    ref = _reference_forward(x1)
    ref = jax.block_until_ready(ref)

    out = model_forward(x1)
    out = jax.block_until_ready(out)

    assert out.shape == ref.shape and out.dtype == ref.dtype

    # Scale-aware f32 check: the collapsed contraction and the step-by-step
    # reference sum the same exact integer-weighted terms in different orders,
    # so differences are pure f32 reordering noise relative to the output scale.
    scale = max(float(jnp.max(jnp.abs(ref))), 1.0)
    max_err = float(jnp.max(jnp.abs(out.astype(jnp.float32) - ref.astype(jnp.float32))))
    assert max_err <= 1e-4 * scale, f"mismatch vs reference: {max_err} (scale {scale})"

    print("KERNEL_OK")
</pallas_src>

<mosaic_0001>
module attributes {stable_mosaic.version = 11 : i64} {
  func.func @kernel(%arg0: memref<3x5x2xf32, #tpu.memory_space<vmem>>, %arg1: memref<3x5x2xf32, #tpu.memory_space<vmem>>) attributes {dimension_semantics = [], scalar_prefetch = 0 : i64, scratch_operands = 0 : i64, tpu.core_type = #tpu.core_type<tc>} {
    %c0 = arith.constant 0 : index
    %c0_0 = arith.constant 0 : index
    %c0_1 = arith.constant 0 : index
    %0 = vector.load %arg0[%c0, %c0_0, %c0_1] : memref<3x5x2xf32, #tpu.memory_space<vmem>>, vector<3x5x2xf32>
    %1 = vector.extract_strided_slice %0 {offsets = [0, 0, 0], sizes = [3, 1, 2], strides = [1, 1, 1]} : vector<3x5x2xf32> to vector<3x1x2xf32>
    %2 = vector.extract_strided_slice %0 {offsets = [0, 1, 0], sizes = [3, 1, 2], strides = [1, 1, 1]} : vector<3x5x2xf32> to vector<3x1x2xf32>
    %3 = vector.extract_strided_slice %0 {offsets = [0, 2, 0], sizes = [3, 1, 2], strides = [1, 1, 1]} : vector<3x5x2xf32> to vector<3x1x2xf32>
    %4 = vector.extract_strided_slice %0 {offsets = [0, 3, 0], sizes = [3, 1, 2], strides = [1, 1, 1]} : vector<3x5x2xf32> to vector<3x1x2xf32>
    %5 = vector.extract_strided_slice %0 {offsets = [0, 4, 0], sizes = [3, 1, 2], strides = [1, 1, 1]} : vector<3x5x2xf32> to vector<3x1x2xf32>
    %cst = arith.constant 5.480000e+02 : f32
    %6 = vector.broadcast %cst : f32 to vector<3x1x2xf32>
    %7 = arith.mulf %2, %6 : vector<3x1x2xf32>
    %8 = arith.addf %1, %7 : vector<3x1x2xf32>
    %cst_2 = arith.constant 2.560000e+02 : f32
    %9 = vector.broadcast %cst_2 : f32 to vector<3x1x2xf32>
    %10 = arith.mulf %3, %9 : vector<3x1x2xf32>
    %11 = arith.addf %8, %10 : vector<3x1x2xf32>
    %cst_3 = arith.constant 1.460000e+02 : f32
    %12 = vector.broadcast %cst_3 : f32 to vector<3x1x2xf32>
    %13 = arith.mulf %4, %12 : vector<3x1x2xf32>
    %14 = arith.addf %11, %13 : vector<3x1x2xf32>
    %cst_4 = arith.constant 7.300000e+01 : f32
    %15 = vector.broadcast %cst_4 : f32 to vector<3x1x2xf32>
    %16 = arith.mulf %5, %15 : vector<3x1x2xf32>
    %17 = arith.addf %14, %16 : vector<3x1x2xf32>
    %c0_5 = arith.constant 0 : index
    %c0_6 = arith.constant 0 : index
    %c0_7 = arith.constant 0 : index
    %18 = vector.load %arg1[%c0_5, %c0_6, %c0_7] : memref<3x5x2xf32, #tpu.memory_space<vmem>>, vector<3x1x2xf32>
    tpu.vector_store %arg1[%c0_5, %c0_6, %c0_7], %17 {strides = array<i32>} : memref<3x5x2xf32, #tpu.memory_space<vmem>>, vector<3x1x2xf32>,
    %cst_8 = arith.constant 5.490000e+02 : f32
    %19 = vector.broadcast %cst_8 : f32 to vector<3x1x2xf32>
    %20 = arith.mulf %2, %19 : vector<3x1x2xf32>
    %cst_9 = arith.constant 2.560000e+02 : f32
    %21 = vector.broadcast %cst_9 : f32 to vector<3x1x2xf32>
    %22 = arith.mulf %3, %21 : vector<3x1x2xf32>
    %23 = arith.addf %20, %22 : vector<3x1x2xf32>
    %cst_10 = arith.constant 1.460000e+02 : f32
    %24 = vector.broadcast %cst_10 : f32 to vector<3x1x2xf32>
    %25 = arith.mulf %4, %24 : vector<3x1x2xf32>
    %26 = arith.addf %23, %25 : vector<3x1x2xf32>
    %cst_11 = arith.constant 7.300000e+01 : f32
    %27 = vector.broadcast %cst_11 : f32 to vector<3x1x2xf32>
    %28 = arith.mulf %5, %27 : vector<3x1x2xf32>
    %29 = arith.addf %26, %28 : vector<3x1x2xf32>
    %c0_12 = arith.constant 0 : index
    %c1 = arith.constant 1 : index
    %c0_13 = arith.constant 0 : index
    %30 = vector.load %arg1[%c0_12, %c1, %c0_13] : memref<3x5x2xf32, #tpu.memory_space<vmem>>, vector<3x1x2xf32>
    tpu.vector_store %arg1[%c0_12, %c1, %c0_13], %29 {strides = array<i32>} : memref<3x5x2xf32, #tpu.memory_space<vmem>>, vector<3x1x2xf32>,
    %cst_14 = arith.constant 5.480000e+02 : f32
    %31 = vector.broadcast %cst_14 : f32 to vector<3x1x2xf32>
    %32 = arith.mulf %2, %31 : vector<3x1x2xf32>
    %cst_15 = arith.constant 2.570000e+02 : f32
    %33 = vector.broadcast %cst_15 : f32 to vector<3x1x2xf32>
    %34 = arith.mulf %3, %33 : vector<3x1x2xf32>
    %35 = arith.addf %32, %34 : vector<3x1x2xf32>
    %cst_16 = arith.constant 1.460000e+02 : f32
    %36 = vector.broadcast %cst_16 : f32 to vector<3x1x2xf32>
    %37 = arith.mulf %4, %36 : vector<3x1x2xf32>
    %38 = arith.addf %35, %37 : vector<3x1x2xf32>
    %cst_17 = arith.constant 7.300000e+01 : f32
    %39 = vector.broadcast %cst_17 : f32 to vector<3x1x2xf32>
    %40 = arith.mulf %5, %39 : vector<3x1x2xf32>
    %41 = arith.addf %38, %40 : vector<3x1x2xf32>
    %c0_18 = arith.constant 0 : index
    %c2 = arith.constant 2 : index
    %c0_19 = arith.constant 0 : index
    %42 = vector.load %arg1[%c0_18, %c2, %c0_19] : memref<3x5x2xf32, #tpu.memory_space<vmem>>, vector<3x1x2xf32>
    tpu.vector_store %arg1[%c0_18, %c2, %c0_19], %41 {strides = array<i32>} : memref<3x5x2xf32, #tpu.memory_space<vmem>>, vector<3x1x2xf32>,
    %cst_20 = arith.constant 5.480000e+02 : f32
    %43 = vector.broadcast %cst_20 : f32 to vector<3x1x2xf32>
    %44 = arith.mulf %2, %43 : vector<3x1x2xf32>
    %cst_21 = arith.constant 2.560000e+02 : f32
    %45 = vector.broadcast %cst_21 : f32 to vector<3x1x2xf32>
    %46 = arith.mulf %3, %45 : vector<3x1x2xf32>
    %47 = arith.addf %44, %46 : vector<3x1x2xf32>
    %cst_22 = arith.constant 1.470000e+02 : f32
    %48 = vector.broadcast %cst_22 : f32 to vector<3x1x2xf32>
    %49 = arith.mulf %4, %48 : vector<3x1x2xf32>
    %50 = arith.addf %47, %49 : vector<3x1x2xf32>
    %cst_23 = arith.constant 7.300000e+01 : f32
    %51 = vector.broadcast %cst_23 : f32 to vector<3x1x2xf32>
    %52 = arith.mulf %5, %51 : vector<3x1x2xf32>
    %53 = arith.addf %50, %52 : vector<3x1x2xf32>
    %c0_24 = arith.constant 0 : index
    %c3 = arith.constant 3 : index
    %c0_25 = arith.constant 0 : index
    %54 = vector.load %arg1[%c0_24, %c3, %c0_25] : memref<3x5x2xf32, #tpu.memory_space<vmem>>, vector<3x1x2xf32>
    tpu.vector_store %arg1[%c0_24, %c3, %c0_25], %53 {strides = array<i32>} : memref<3x5x2xf32, #tpu.memory_space<vmem>>, vector<3x1x2xf32>,
    %cst_26 = arith.constant 5.480000e+02 : f32
    %55 = vector.broadcast %cst_26 : f32 to vector<3x1x2xf32>
    %56 = arith.mulf %2, %55 : vector<3x1x2xf32>
    %cst_27 = arith.constant 2.560000e+02 : f32
    %57 = vector.broadcast %cst_27 : f32 to vector<3x1x2xf32>
    %58 = arith.mulf %3, %57 : vector<3x1x2xf32>
    %59 = arith.addf %56, %58 : vector<3x1x2xf32>
    %cst_28 = arith.constant 1.460000e+02 : f32
    %60 = vector.broadcast %cst_28 : f32 to vector<3x1x2xf32>
    %61 = arith.mulf %4, %60 : vector<3x1x2xf32>
    %62 = arith.addf %59, %61 : vector<3x1x2xf32>
    %cst_29 = arith.constant 7.400000e+01 : f32
    %63 = vector.broadcast %cst_29 : f32 to vector<3x1x2xf32>
    %64 = arith.mulf %5, %63 : vector<3x1x2xf32>
    %65 = arith.addf %62, %64 : vector<3x1x2xf32>
    %c0_30 = arith.constant 0 : index
    %c4 = arith.constant 4 : index
    %c0_31 = arith.constant 0 : index
    %66 = vector.load %arg1[%c0_30, %c4, %c0_31] : memref<3x5x2xf32, #tpu.memory_space<vmem>>, vector<3x1x2xf32>
    tpu.vector_store %arg1[%c0_30, %c4, %c0_31], %65 {strides = array<i32>} : memref<3x5x2xf32, #tpu.memory_space<vmem>>, vector<3x1x2xf32>,
    return
  }
}

</mosaic_0001>

<bundles_post_ra>
// kernel: tpu_custom_call.1
= control target key start
LH: loop header
LB: loop body
LE: loop exit
PB: predicated region body
PF: predicated region fallthrough
CT: control target
= control target key end

     0   :  { %vm71_vm0 = vcmask 8192   ;;  %vm105_vm1 = vcmask 9217   ;;  %s312_s0 = inlined_call_operand.vmem [shape: f32[3,5,2], index: 0, kind: input, shape index: {}, may-alias: {0,1}]   ;;  %s313_s1 = inlined_call_operand.vmem [shape: f32[3,5,2], index: 1, kind: output, shape index: {}, may-alias: {0,1}]  }
   0x1   :  { %v195_v0 = vld [vmem:[%s312_s0] sm:$0x1f]  ;;  %v200_v1 = vld [vmem:[%s312_s0 + $0x8] sm:$0x1f]  ;;  %v221_v10 = vld [vmem:[%s312_s0 + $0x10] sm:$0x1f] }
   0x2   :  { %v203_v2 = vmul.f32 548.0, %v195_v0  ;;  %v206_v3 = vmul.f32 256.0, %v195_v0  ;;  %v41_v4 = vmul.f32 146.0, %v195_v0  ;;  %v56_v5 = vmul.f32 73.0, %v195_v0 }
   0x3   :  { %v211_v6 = vmul.f32 548.0, %v200_v1  ;;  %v214_v7 = vmul.f32 256.0, %v200_v1  ;;  %v42_v8 = vmul.f32 146.0, %v200_v1  ;;  %v57_v9 = vmul.f32 73.0, %v200_v1 }
   0x4   :  { %v17_v11 = vrot.slane %v203_v2, 1  ;;  %v32_v12 = vrot.slane %v206_v3, 2  ;;  %v47_v13 = vrot.slane %v41_v4, 3  ;;  %v62_v14 = vrot.slane %v56_v5, 4 }
   0x5   :  { %v18_v15 = vrot.slane %v211_v6, 1  ;;  %v33_v16 = vrot.slane %v214_v7, 2  ;;  %v48_v17 = vrot.slane %v42_v8, 3  ;;  %v63_v18 = vrot.slane %v57_v9, 4 }
   0x6   :  { %v23_v19 = vadd.f32 %v17_v11, %v195_v0  ;;  %v13_v20 = vmul.f32 548.0, %v221_v10  ;;  %v28_v21 = vmul.f32 256.0, %v221_v10  ;;  %v43_v22 = vmul.f32 146.0, %v221_v10 }
   0x7   :  { %v24_v23 = vadd.f32 %v18_v15, %v200_v1  ;;  %v58_v24 = vmul.f32 73.0, %v221_v10  ;;  %v75_v25 = vmul.f32 549.0, %v195_v0  ;;  %v78_v26 = vrot.slane %v206_v3, 1 }
   0x8   :  { %v38_v27 = vadd.f32 %v32_v12, %v23_v19  ;;  %v19_v28 = vrot.slane %v13_v20, 1  ;;  %v34_v29 = vrot.slane %v28_v21, 2  ;;  %v49_v30 = vrot.slane %v43_v22, 3 }
   0x9   :  { %v39_v31 = vadd.f32 %v33_v16, %v24_v23  ;;  %v64_v32 = vrot.slane %v58_v24, 4  ;;  %v84_v33 = vadd.f32 %v78_v26, %v75_v25  ;;  %v87_v34 = vrot.slane %v41_v4, 2 }
   0xa   :  { %v53_v35 = vadd.f32 %v47_v13, %v38_v27  ;;  %v25_v36 = vadd.f32 %v19_v28, %v221_v10  ;;  %v96_v37 = vrot.slane %v56_v5, 3  ;;  %v76_v38 = vmul.f32 549.0, %v200_v1 }
   0xb   :  { %v54_v39 = vadd.f32 %v48_v17, %v39_v31  ;;  %v93_v40 = vadd.f32 %v87_v34, %v84_v33  ;;  %v79_v41 = vrot.slane %v214_v7, 1  ;;  %v88_v42 = vrot.slane %v42_v8, 2 }
   0xc   :  { %v68_v43 = vadd.f32 %v62_v14, %v53_v35  ;;  %v40_v44 = vadd.f32 %v34_v29, %v25_v36  ;;  %v97_v45 = vrot.slane %v57_v9, 3  ;;  %v77_v46 = vmul.f32 549.0, %v221_v10 }
   0xd   :  { %v69_v47 = vadd.f32 %v63_v18, %v54_v39  ;;  %v102_v48 = vadd.f32 %v96_v37, %v93_v40  ;;  %v85_v49 = vadd.f32 %v79_v41, %v76_v38  ;;  %v80_v50 = vrot.slane %v28_v21, 1 }
   0xe   :  { %72 = vst.msk [vmem:[%s313_s1] sm:$0x1] %vm71_vm0, %v68_v43  ;;  %v55_v51 = vadd.f32 %v49_v30, %v40_v44  ;;  %v89_v52 = vrot.slane %v43_v22, 2  ;;  %v98_v53 = vrot.slane %v58_v24, 3  ;;  %v109_v54 = vmul.f32 257.0, %v195_v0 }
   0xf   :  { %73 = vst.msk [vmem:[%s313_s1 + $0x8] sm:$0x1] %vm71_vm0, %v69_v47  ;;  %v94_v55 = vadd.f32 %v88_v42, %v85_v49  ;;  %v86_v56 = vadd.f32 %v80_v50, %v77_v46  ;;  %v110_v57 = vmul.f32 257.0, %v200_v1  ;;  %v111_v58 = vmul.f32 257.0, %v221_v10 }
  0x10   :  { %106 = vst.msk [vmem:[%s313_s1] sm:$0x2] %vm105_vm1, %v102_v48  ;;  %v70_v59 = vadd.f32 %v64_v32, %v55_v51  ;;  %v115_v60 = vrot.slane %v109_v54, 1  ;;  %v133_v61 = vadd.f32 %v78_v26, %v203_v2  ;;  %v136_v62 = vmul.f32 147.0, %v195_v0 }
  0x11   :  { %v103_v63 = vadd.f32 %v97_v45, %v94_v55  ;;  %v95_v3 = vadd.f32 %v89_v52, %v86_v56  ;;  %v116_v4 = vrot.slane %v110_v57, 1  ;;  %v117_v5 = vrot.slane %v111_v58, 1 }
  0x12   :  { %74 = vst.msk [vmem:[%s313_s1 + $0x10] sm:$0x1] %vm71_vm0, %v70_v59  ;;  %v121_v7 = vadd.f32 %v115_v60, %v203_v2  ;;  %v142_v8 = vrot.slane %v136_v62, 2  ;;  %v134_v9 = vadd.f32 %v79_v41, %v211_v6  ;;  %v137_v11 = vmul.f32 147.0, %v200_v1 }
  0x13   :  { %107 = vst.msk [vmem:[%s313_s1 + $0x8] sm:$0x2] %vm105_vm1, %v103_v63  ;;  %v104_v12 = vadd.f32 %v98_v53, %v95_v3  ;;  %v122_v13 = vadd.f32 %v116_v4, %v211_v6  ;;  %v123_v14 = vadd.f32 %v117_v5, %v13_v20  ;;  %v135_v15 = vadd.f32 %v80_v50, %v13_v20 }
  0x14   :  { %v124_v16 = vadd.f32 %v121_v7, %v87_v34  ;;  %v148_v17 = vadd.f32 %v142_v8, %v133_v61  ;;  %v143_v18 = vrot.slane %v137_v11, 2  ;;  %v138_v2 = vmul.f32 147.0, %v221_v10 }
  0x15   :  { %108 = vst.msk [vmem:[%s313_s1 + $0x10] sm:$0x2] %vm105_vm1, %v104_v12  ;;  %v125_v19 = vadd.f32 %v122_v13, %v88_v42  ;;  %v126_v21 = vadd.f32 %v123_v14, %v89_v52  ;;  %v157_v22 = vadd.f32 %v133_v61, %v87_v34  ;;  %v160_v23 = vmul.f32 74.0, %v195_v0 }
  0x16   :  { %v127_v24 = vadd.f32 %v124_v16, %v96_v37  ;;  %v151_v25 = vadd.f32 %v148_v17, %v96_v37  ;;  %v149_v6 = vadd.f32 %v143_v18, %v134_v9  ;;  %v144_v26 = vrot.slane %v138_v2, 2 }
  0x17   :  { %v128_v20 = vadd.f32 %v125_v19, %v97_v45  ;;  %v129_v27 = vadd.f32 %v126_v21, %v98_v53  ;;  %v166_v28 = vrot.slane %v160_v23, 3  ;;  %v158_v0 = vadd.f32 %v134_v9, %v88_v42 }
  0x18   :  { %130 = vst.msk [vmem:[%s313_s1 + $0x1] sm:$0x2] %vm105_vm1, %v127_v24  ;;  %154 = vst.msk [vmem:[%s313_s1 + $0x2] sm:$0x2] %vm105_vm1, %v151_v25  ;;  %v152_v29 = vadd.f32 %v149_v6, %v97_v45  ;;  %v150_v30 = vadd.f32 %v144_v26, %v135_v15  ;;  %v161_v31 = vmul.f32 74.0, %v200_v1  ;;  %v159_v33 = vadd.f32 %v135_v15, %v89_v52 }
  0x19   :  { %131 = vst.msk [vmem:[%s313_s1 + $0x9] sm:$0x2] %vm105_vm1, %v128_v20  ;;  %132 = vst.msk [vmem:[%s313_s1 + $0x11] sm:$0x2] %vm105_vm1, %v129_v27  ;;  %v172_v32 = vadd.f32 %v166_v28, %v157_v22  ;;  %v162_v34 = vmul.f32 74.0, %v221_v10 }
  0x1a   :  { %155 = vst.msk [vmem:[%s313_s1 + $0xa] sm:$0x2] %vm105_vm1, %v152_v29  ;;  %v153_v1 = vadd.f32 %v150_v30, %v98_v53  ;;  %v167_v35 = vrot.slane %v161_v31, 3 }
  0x1b   :  { %175 = vst.msk [vmem:[%s313_s1 + $0x3] sm:$0x2] %vm105_vm1, %v172_v32  ;;  %v168_v36 = vrot.slane %v162_v34, 3 }
  0x1c   :  { %156 = vst.msk [vmem:[%s313_s1 + $0x12] sm:$0x2] %vm105_vm1, %v153_v1  ;;  %v173_v37 = vadd.f32 %v167_v35, %v158_v0 }
  0x1d   :  { %v174_v10 = vadd.f32 %v168_v36, %v159_v33 }
  0x1e   :  { %176 = vst.msk [vmem:[%s313_s1 + $0xb] sm:$0x2] %vm105_vm1, %v173_v37 }
  0x1f   :  { %177 = vst.msk [vmem:[%s313_s1 + $0x13] sm:$0x2] %vm105_vm1, %v174_v10 }

</bundles_post_ra>
